<compile_context>
chip_gen: v7x
topology: tpu7x:2x2x1
jax: 0.10.0
libtpu: 0.0.40
codegen_flags: <defaults>
</compile_context>

<pallas_src>
import jax
import jax.numpy as jnp
from jax.experimental import pallas as pl
from jax.experimental.pallas import tpu as pltpu

K_PAD = 896     # 784 padded up to 7 * 128
H_DIM = 128     # hidden width (already lane-aligned)
N_PAD = 128     # 10 padded up to full lane width
TM_MAX = 1024   # batch tile cap (safe on v5e/v6e/v7x scoped VMEM budgets)


def _round_up(x, m):
    return ((x + m - 1) // m) * m


def mnist_mlp_kernel(x_ref, w1_ref, b1_ref, w2_ref, b2_ref, o_ref):
    # x_ref : (TM, 896)  bf16     w1_ref: (896, 128) bf16    b1_ref: (1, 128) f32
    # w2_ref: (128, 128) bf16     b2_ref: (1, 128)   f32     o_ref : (TM, 128) f32
    h = jnp.dot(x_ref[...], w1_ref[...], preferred_element_type=jnp.float32)
    h = jnp.maximum(h + b1_ref[...], 0.0)                       # bias + ReLU in f32
    logits = jnp.dot(h.astype(jnp.bfloat16), w2_ref[...],
                     preferred_element_type=jnp.float32) + b2_ref[...]
    # Sigmoid: exp on the EUP; approx reciprocal also on the EUP (VALU stays free).
    o_ref[...] = pl.reciprocal(1.0 + jnp.exp(-logits), approx=True)


def mnist_net_forward(x_nchw, w1, b1, w2, b2):
    """Forward pass matching MNISTNet.forward. x_nchw: (B, 1, 28, 28)."""
    B = x_nchw.shape[0]
    x_flat = x_nchw.reshape(B, 28 * 28).astype(jnp.float32)     # nn.Flatten (NCHW row-major)

    # ---- batch tiling --------------------------------------------------------
    B_pad = _round_up(max(B, 8), 8)
    TM = min(TM_MAX, B_pad)
    B_pad = _round_up(B_pad, TM)
    n_tiles = B_pad // TM

    # ---- pad K -> 896, N -> 128; cast big operands to bf16 -------------------
    x_p = jnp.zeros((B_pad, K_PAD), jnp.float32).at[:B, :784].set(x_flat)
    x_p = x_p.astype(jnp.bfloat16)
    w1_p = jnp.zeros((K_PAD, H_DIM), jnp.float32).at[:784, :].set(w1).astype(jnp.bfloat16)
    b1_p = b1.reshape(1, H_DIM).astype(jnp.float32)
    w2_p = jnp.zeros((H_DIM, N_PAD), jnp.float32).at[:, :10].set(w2).astype(jnp.bfloat16)
    b2_p = jnp.zeros((1, N_PAD), jnp.float32).at[:, :10].set(b2.reshape(1, 10))

    cost = pl.CostEstimate(
        flops=2 * B_pad * K_PAD * H_DIM + 2 * B_pad * H_DIM * N_PAD,
        transcendentals=B_pad * N_PAD,
        bytes_accessed=(B_pad * K_PAD * 2 + K_PAD * H_DIM * 2 + H_DIM * N_PAD * 2
                        + 2 * N_PAD * 4 + B_pad * N_PAD * 4),
    )

    out = pl.pallas_call(
        mnist_mlp_kernel,
        out_shape=jax.ShapeDtypeStruct((B_pad, N_PAD), jnp.float32),
        grid=(n_tiles,),
        in_specs=[
            pl.BlockSpec((TM, K_PAD), lambda i: (i, 0)),      # x tile (pipelined per step)
            pl.BlockSpec((K_PAD, H_DIM), lambda i: (0, 0)),   # w1 (VMEM-resident, no re-DMA)
            pl.BlockSpec((1, H_DIM), lambda i: (0, 0)),       # b1
            pl.BlockSpec((H_DIM, N_PAD), lambda i: (0, 0)),   # w2 (padded to N=128)
            pl.BlockSpec((1, N_PAD), lambda i: (0, 0)),       # b2 (padded)
        ],
        out_specs=pl.BlockSpec((TM, N_PAD), lambda i: (i, 0)),
        compiler_params=pltpu.CompilerParams(
            dimension_semantics=("parallel",)),
        cost_estimate=cost,
    )(x_p, w1_p, b1_p, w2_p, b2_p)

    # Drop batch padding and the 118 zero-padded output columns.
    return out[:B, :10]


def init_params(key):
    """Deterministic init, same shapes as nn.Linear (weights stored transposed)."""
    k1, k2, k3, k4 = jax.random.split(key, 4)
    bound1 = 1.0 / jnp.sqrt(784.0)
    bound2 = 1.0 / jnp.sqrt(128.0)
    w1 = jax.random.uniform(k1, (784, 128), jnp.float32, -bound1, bound1)
    b1 = jax.random.uniform(k2, (128,), jnp.float32, -bound1, bound1)
    w2 = jax.random.uniform(k3, (128, 10), jnp.float32, -bound2, bound2)
    b2 = jax.random.uniform(k4, (10,), jnp.float32, -bound2, bound2)
    return w1, b1, w2, b2


if __name__ == "__main__":
    key = jax.random.PRNGKey(0)
    k_x, k_p = jax.random.split(key)

    B = 8
    x = jax.random.normal(k_x, (B, 1, 28, 28), dtype=jnp.float32)  # NCHW, MNIST-shaped
    w1, b1, w2, b2 = init_params(k_p)

    out = mnist_net_forward(x, w1, b1, w2, b2)
    out = jax.block_until_ready(out)

    # Sanity: correct shape, sigmoid range.
    assert out.shape == (B, 10)
    assert bool(jnp.all((out >= 0.0) & (out <= 1.0)))

    # Cross-check against the plain-JAX f32 reference (bf16 compute + approx
    # reciprocal inside the kernel -> loose-ish tolerance, f32 accumulation
    # keeps it well within 2e-2 on sigmoid outputs).
    ref = jax.nn.sigmoid(
        jnp.maximum(x.reshape(B, 784) @ w1 + b1, 0.0) @ w2 + b2
    )
    assert bool(jnp.allclose(out, ref, atol=2e-2, rtol=0.0))

    print("KERNEL_OK")
</pallas_src>

<mosaic_0001>
module attributes {stable_mosaic.version = 11 : i64} {
  func.func @mnist_mlp_kernel(%arg0: i32, %arg1: memref<8x896xbf16, #tpu.memory_space<vmem>>, %arg2: memref<896x128xbf16, #tpu.memory_space<vmem>>, %arg3: memref<1x128xf32, #tpu.memory_space<vmem>>, %arg4: memref<128x128xbf16, #tpu.memory_space<vmem>>, %arg5: memref<1x128xf32, #tpu.memory_space<vmem>>, %arg6: memref<8x128xf32, #tpu.memory_space<vmem>>) attributes {dimension_semantics = [#tpu.dimension_semantics<parallel>], iteration_bounds = array<i64: 1>, scalar_prefetch = 0 : i64, scratch_operands = 0 : i64, tpu.core_type = #tpu.core_type<tc>, window_params = [{transform_indices = @transform_0, window_bounds = array<i64: 8, 896>}, {pipeline_mode = #tpu.pipeline_mode<synchronous>, transform_indices = @transform_1, window_bounds = array<i64: 896, 128>}, {pipeline_mode = #tpu.pipeline_mode<synchronous>, transform_indices = @transform_2, window_bounds = array<i64: 1, 128>}, {pipeline_mode = #tpu.pipeline_mode<synchronous>, transform_indices = @transform_3, window_bounds = array<i64: 128, 128>}, {pipeline_mode = #tpu.pipeline_mode<synchronous>, transform_indices = @transform_4, window_bounds = array<i64: 1, 128>}, {transform_indices = @transform_5, window_bounds = array<i64: 8, 128>}]} {
    %c0 = arith.constant 0 : index
    %c0_0 = arith.constant 0 : index
    %0 = vector.load %arg1[%c0, %c0_0] : memref<8x896xbf16, #tpu.memory_space<vmem>>, vector<8x896xbf16>
    %c0_1 = arith.constant 0 : index
    %c0_2 = arith.constant 0 : index
    %1 = vector.load %arg2[%c0_1, %c0_2] : memref<896x128xbf16, #tpu.memory_space<vmem>>, vector<896x128xbf16>
    %cst = arith.constant dense<0.000000e+00> : vector<8x128xf32>
    %2 = tpu.matmul %0, %1, %cst {dimension_numbers = #tpu.dot_dimension_numbers<[1], [0], [0], [1], [0, 0, 1, 1], [], []>} : vector<8x896xbf16>, vector<896x128xbf16>, vector<8x128xf32> -> vector<8x128xf32>
    %c0_3 = arith.constant 0 : index
    %c0_4 = arith.constant 0 : index
    %3 = vector.load %arg3[%c0_3, %c0_4] : memref<1x128xf32, #tpu.memory_space<vmem>>, vector<1x128xf32>
    %4 = vector.broadcast %3 : vector<1x128xf32> to vector<8x128xf32>
    %5 = arith.addf %2, %4 : vector<8x128xf32>
    %cst_5 = arith.constant 0.000000e+00 : f32
    %6 = vector.broadcast %cst_5 : f32 to vector<8x128xf32>
    %7 = arith.maximumf %5, %6 : vector<8x128xf32>
    %8 = arith.truncf %7 : vector<8x128xf32> to vector<8x128xbf16>
    %c0_6 = arith.constant 0 : index
    %c0_7 = arith.constant 0 : index
    %9 = vector.load %arg4[%c0_6, %c0_7] : memref<128x128xbf16, #tpu.memory_space<vmem>>, vector<128x128xbf16>
    %cst_8 = arith.constant dense<0.000000e+00> : vector<8x128xf32>
    %10 = tpu.matmul %8, %9, %cst_8 {dimension_numbers = #tpu.dot_dimension_numbers<[1], [0], [0], [1], [0, 0, 1, 1], [], []>} : vector<8x128xbf16>, vector<128x128xbf16>, vector<8x128xf32> -> vector<8x128xf32>
    %c0_9 = arith.constant 0 : index
    %c0_10 = arith.constant 0 : index
    %11 = vector.load %arg5[%c0_9, %c0_10] : memref<1x128xf32, #tpu.memory_space<vmem>>, vector<1x128xf32>
    %12 = vector.broadcast %11 : vector<1x128xf32> to vector<8x128xf32>
    %13 = arith.addf %10, %12 : vector<8x128xf32>
    %cst_11 = arith.constant 0.000000e+00 : f32
    %14 = vector.broadcast %cst_11 : f32 to vector<8x128xf32>
    %15 = arith.subf %14, %13 : vector<8x128xf32>
    %16 = math.exp %15 : vector<8x128xf32>
    %cst_12 = arith.constant 1.000000e+00 : f32
    %17 = vector.broadcast %cst_12 : f32 to vector<8x128xf32>
    %18 = arith.addf %17, %16 : vector<8x128xf32>
    %19 = tpu.reciprocal %18 {approx = true} : vector<8x128xf32> -> vector<8x128xf32>
    %c0_13 = arith.constant 0 : index
    %c0_14 = arith.constant 0 : index
    %20 = vector.load %arg6[%c0_13, %c0_14] : memref<8x128xf32, #tpu.memory_space<vmem>>, vector<8x128xf32>
    tpu.vector_store %arg6[%c0_13, %c0_14], %19 {strides = array<i32>} : memref<8x128xf32, #tpu.memory_space<vmem>>, vector<8x128xf32>,
    return
  }
  func.func @transform_0(%arg0: i32) -> (i32, i32) {
    %c0_i32 = arith.constant 0 : i32
    %c0_i32_0 = arith.constant 0 : i32
    return %arg0, %c0_i32 : i32, i32
  }
  func.func @transform_1(%arg0: i32) -> (i32, i32) {
    %c0_i32 = arith.constant 0 : i32
    %c0_i32_0 = arith.constant 0 : i32
    %c0_i32_1 = arith.constant 0 : i32
    return %c0_i32, %c0_i32_0 : i32, i32
  }
  func.func @transform_2(%arg0: i32) -> (i32, i32) {
    %c0_i32 = arith.constant 0 : i32
    %c0_i32_0 = arith.constant 0 : i32
    %c0_i32_1 = arith.constant 0 : i32
    return %c0_i32, %c0_i32_0 : i32, i32
  }
  func.func @transform_3(%arg0: i32) -> (i32, i32) {
    %c0_i32 = arith.constant 0 : i32
    %c0_i32_0 = arith.constant 0 : i32
    %c0_i32_1 = arith.constant 0 : i32
    return %c0_i32, %c0_i32_0 : i32, i32
  }
  func.func @transform_4(%arg0: i32) -> (i32, i32) {
    %c0_i32 = arith.constant 0 : i32
    %c0_i32_0 = arith.constant 0 : i32
    %c0_i32_1 = arith.constant 0 : i32
    return %c0_i32, %c0_i32_0 : i32, i32
  }
  func.func @transform_5(%arg0: i32) -> (i32, i32) {
    %c0_i32 = arith.constant 0 : i32
    %c0_i32_0 = arith.constant 0 : i32
    return %arg0, %c0_i32 : i32, i32
  }
}

</mosaic_0001>

<bundles_post_ra>
// kernel: tpu_custom_call.1
= control target key start
LH: loop header
LB: loop body
LE: loop exit
PB: predicated region body
PF: predicated region fallthrough
CT: control target
= control target key end

     0   :  { %10 = vsyncpa [#allocation3], 0  ;;  %s1332_s0 = inlined_call_operand.hbm [shape: bf16[8,896], index: 0, kind: input, shape index: {}]   ;;  %s1333_s1 = inlined_call_operand.hbm [shape: bf16[896,128], index: 1, kind: input, shape index: {}]   ;;  %s1334_s2 = inlined_call_operand.vmem [shape: f32[1,128], index: 2, kind: input, shape index: {}]   ;;  %s1335_s3 = inlined_call_operand.hbm [shape: bf16[128,128], index: 3, kind: input, shape index: {}]   ;;  %s1336_s4 = inlined_call_operand.vmem [shape: f32[1,128], index: 4, kind: input, shape index: {}]   ;;  %s1337_s5 = inlined_call_operand.hbm [shape: f32[8,128], index: 5, kind: output, shape index: {}]  }
   0x1   :  { %11 = vsyncpa [#allocation6], 0 }
   0x2   :  { %12 = vsyncpa [#allocation4], 0  ;;  %s1214_s18 = smov [#allocation5]   ;;  %s1120_s22 = scalar_lea.hbm %s1333_s1, 7168 }
   0x3   :  { %s28_s19 = sshll.u32 %s1214_s18, 4  ;;  %p1121_p0 = scmp.ne.s32.totalorder %s1333_s1, %s1120_s22  ;;  %s29_s19 = int_to_ptr.vmem [resolvable:$true] %s28_s19 }
   0x4   :  { %p1124_p1 = scmp.lt.u32.totalorder %s1120_s22, %s1333_s1 }
   0x6   :  { %p1126_p2 = pnand %p1124_p1, %p1121_p0 }
   0x8   :  { %1129 = shalt.err (!%p1126_p2)
}
   0x9   :  { %s1130_s27 = scalar_lea.vmem %s29_s19, 7168  ;;  %p1135_p4 = scmp.lt.s32.totalorder %s29_s19, %s29_s19 }
   0xa   :  { %p1131_p3 = scmp.ne.s32.totalorder %s29_s19, %s1130_s27  ;;  %p1136_p5 = scmp.lt.s32.totalorder %s1130_s27, %s1130_s27 }
   0xc   :  { %p1137_p6 = por %p1136_p5, %p1135_p4 }
   0xe   :  { %p1138_p7 = pnand %p1137_p6, %p1131_p3 }
  0x10   :  { %1141 = shalt.err (!%p1138_p7)
}
  0x11   :  { %s1215_s28 = smov 64   ;;  %s1216_s29 = smov 4  }
  0x12   :  { %34 = dma.hbm_to_vmem [thread:$0]  %s1333_s1, 7168, %s29_s19, [#allocation6], %s1215_s28, %s1215_s28, %s1216_s29  }
  0x13   :  { %s1217_s7 = smov [#allocation2]   ;;  %s1218_s9 = smov [#allocation7]  }
  0x14   :  { %s19_s8 = sshll.u32 %s1217_s7, 4  ;;  %s42_s10 = sshll.u32 %s1218_s9, 4  ;;  %s20_s8 = int_to_ptr.vmem [resolvable:$true] %s19_s8  ;;  %s43_s10 = int_to_ptr.vmem [resolvable:$true] %s42_s10 }
  0x15   :  { %s1142_s13 = scalar_lea.hbm %s1332_s0, 448 }
  0x16   :  { %p1143_p8 = scmp.ne.s32.totalorder %s1332_s0, %s1142_s13  ;;  %p1146_p9 = scmp.lt.u32.totalorder %s1142_s13, %s1332_s0 }
  0x18   :  { %p1148_p10 = pnand %p1146_p9, %p1143_p8 }
  0x1a   :  { %1151 = shalt.err (!%p1148_p10)
}
  0x1b   :  { %s1152_s1 = scalar_lea.vmem %s20_s8, 448  ;;  %p1157_p12 = scmp.lt.s32.totalorder %s20_s8, %s20_s8 }
  0x1c   :  { %p1153_p11 = scmp.ne.s32.totalorder %s20_s8, %s1152_s1  ;;  %p1158_p13 = scmp.lt.s32.totalorder %s1152_s1, %s1152_s1 }
  0x1e   :  { %p1159_p0 = por %p1158_p13, %p1157_p12 }
  0x20   :  { %p1160_p1 = pnand %p1159_p0, %p1153_p11 }
  0x22   :  { %1163 = shalt.err (!%p1160_p1)
}
  0x23   :  { %22 = dma.hbm_to_vmem [thread:$0]  %s1332_s0, 448, %s20_s8, [#allocation3]  }
  0x24   :  { %s1164_s22 = scalar_lea.hbm %s1335_s3, 1024 }
  0x25   :  { %p1165_p2 = scmp.ne.s32.totalorder %s1335_s3, %s1164_s22  ;;  %p1168_p3 = scmp.lt.u32.totalorder %s1164_s22, %s1335_s3 }
  0x27   :  { %p1170_p4 = pnand %p1168_p3, %p1165_p2 }
  0x29   :  { %1173 = shalt.err (!%p1170_p4)
}
  0x2a   :  { %s1174_s27 = scalar_lea.vmem %s43_s10, 1024  ;;  %p1179_p6 = scmp.lt.s32.totalorder %s43_s10, %s43_s10 }
  0x2b   :  { %p1175_p5 = scmp.ne.s32.totalorder %s43_s10, %s1174_s27  ;;  %p1180_p7 = scmp.lt.s32.totalorder %s1174_s27, %s1174_s27 }
  0x2d   :  { %p1181_p8 = por %p1180_p7, %p1179_p6 }
  0x2f   :  { %p1182_p9 = pnand %p1181_p8, %p1175_p5 }
  0x31   :  { %1185 = shalt.err (!%p1182_p9)
}
  0x32   :  { %48 = dma.hbm_to_vmem [thread:$0]  %s1335_s3, 1024, %s43_s10, [#allocation6], %s1215_s28, %s1215_s28, %s1216_s29  }
  0x33   :  { %1208 = dma.done.wait [#allocation3], 448  }
  0x34   :  { %1209 = vsyncadd [#allocation3], 4294966848 }
  0x35   :  { %1210 = dma.done.wait [#allocation6], 8192  }
  0x36   :  { %1211 = vsyncadd [#allocation6], 4294959104  ;;  %v1045_v0 = vld [vmem:[#allocation5 + $0x40] sm:$0xff]   ;;  %v1049_v4 = vld [vmem:[#allocation5 + $0x48] sm:$0xff]   ;;  %v1219_v42 = vmov 0.0   ;;  %vm1220_vm0 = vmmov 0  }
  0x37   :  { %v1046_v1 = vld [vmem:[#allocation5] sm:$0xff]   ;;  %913 = vmatprep.subr.bf16.mxu0 %v1045_v0  ;;  %v1050_v5 = vld [vmem:[#allocation5 + $0x8] sm:$0xff]   ;;  %v1053_v8 = vld [vmem:[#allocation5 + $0x50] sm:$0xff]   ;;  %s1221_s6 = smov [#allocation8]  }
  0x38   :  { %v1047_v2 = vld [vmem:[#allocation5 + $0xc0] sm:$0xff]   ;;  %914 = vmatpush3.bf16.msra.mxu0 %v1046_v1  ;;  %v1051_v6 = vld [vmem:[#allocation5 + $0xc8] sm:$0xff]   ;;  %v1054_v9 = vld [vmem:[#allocation5 + $0x10] sm:$0xff]   ;;  %s830_s7 = sshll.u32 %s1221_s6, 4  ;;  %s831_s7 = int_to_ptr.vmem [resolvable:$true] %s830_s7 }
  0x39   :  { %v1048_v3 = vld [vmem:[#allocation5 + $0x80] sm:$0xff]   ;;  %935 = vmatprep.subr.bf16.mxu1 %v1047_v2  ;;  %915 = vmatprep.subr.bf16.mxu0 %v1049_v4  ;;  %v1052_v7 = vld [vmem:[#allocation5 + $0x88] sm:$0xff]   ;;  %v1055_v10 = vld [vmem:[#allocation5 + $0xd0] sm:$0xff]   ;;  %s1186_s8 = scalar_lea.vmem %s831_s7, 128  ;;  %p1191_p11 = scmp.lt.s32.totalorder %s831_s7, %s831_s7 }
  0x3a   :  { %936 = vmatpush3.bf16.msra.mxu1 %v1048_v3  ;;  %v1056_v11 = vld [vmem:[#allocation5 + $0x90] sm:$0xff]   ;;  %v1057_v12 = vld [vmem:[#allocation5 + $0x58] sm:$0xff]   ;;  %v1061_v16 = vld [vmem:[#allocation5 + $0x60] sm:$0xff]   ;;  %p1187_p10 = scmp.ne.s32.totalorder %s831_s7, %s1186_s8  ;;  %p1192_p12 = scmp.lt.s32.totalorder %s1186_s8, %s1186_s8 }
  0x3b   :  { %937 = vmatprep.subr.bf16.mxu1 %v1051_v6  ;;  %v1058_v13 = vld [vmem:[#allocation5 + $0x18] sm:$0xff]   ;;  %v1062_v17 = vld [vmem:[#allocation5 + $0x20] sm:$0xff]   ;;  %v1065_v20 = vld [vmem:[#allocation5 + $0x68] sm:$0xff]  }
  0x3c   :  { %916 = vmatpush3.bf16.msra.mxu0 %v1050_v5  ;;  %v1059_v14 = vld [vmem:[#allocation5 + $0xd8] sm:$0xff]   ;;  %v1063_v18 = vld [vmem:[#allocation5 + $0xe0] sm:$0xff]   ;;  %v1066_v21 = vld [vmem:[#allocation5 + $0x28] sm:$0xff]   ;;  %p1193_p13 = por %p1192_p12, %p1191_p11 }
  0x3d   :  { %917 = vmatprep.subr.bf16.mxu0 %v1053_v8  ;;  %v1060_v15 = vld [vmem:[#allocation5 + $0x98] sm:$0xff]   ;;  %v1064_v19 = vld [vmem:[#allocation5 + $0xa0] sm:$0xff]   ;;  %v1067_v22 = vld [vmem:[#allocation5 + $0xe8] sm:$0xff]  }
  0x3e   :  { %938 = vmatpush3.bf16.msra.mxu1 %v1052_v7  ;;  %v1068_v23 = vld [vmem:[#allocation5 + $0xa8] sm:$0xff]   ;;  %v1069_v24 = vld [vmem:[#allocation5 + $0x70] sm:$0xff]   ;;  %v1073_v28 = vld [vmem:[#allocation5 + $0x78] sm:$0xff]   ;;  %p1194_p0 = pnand %p1193_p13, %p1187_p10 }
  0x3f   :  { %939 = vmatprep.subr.bf16.mxu1 %v1055_v10  ;;  %v1070_v25 = vld [vmem:[#allocation5 + $0x30] sm:$0xff]   ;;  %v1074_v29 = vld [vmem:[#allocation5 + $0x38] sm:$0xff]   ;;  %v61_v31 = vld [vmem:[#allocation2] sm:$0xff] }
  0x40   :  { %918 = vmatpush3.bf16.msra.mxu0 %v1054_v9  ;;  %v1071_v26 = vld [vmem:[#allocation5 + $0xf0] sm:$0xff]   ;;  %v1075_v30 = vld [vmem:[#allocation5 + $0xf8] sm:$0xff]   ;;  %v841_v32 = vcombine.low %v61_v31, %v61_v31  ;;  %v842_v33 = vcombine.high %v61_v31, %v61_v31  ;;  %v1079_v35 = vld [vmem:[#allocation5 + $0x140] sm:$0xff]  }
  0x41   :  { %919 = vmatprep.subr.bf16.mxu0 %v1057_v12  ;;  %v1072_v27 = vld [vmem:[#allocation5 + $0xb0] sm:$0xff]   ;;  %v1078_v34 = vld [vmem:[#allocation5 + $0xb8] sm:$0xff]   ;;  %v1082_v39 = vld [vmem:[#allocation5 + $0x100] sm:$0xff]  }
  0x42   :  { %940 = vmatpush3.bf16.msra.mxu1 %v1056_v11  ;;  %v62_v36 = vld [vmem:[#allocation2 + $0x8] sm:$0xff]  ;;  %577 = vmatprep.mubr.bf16.mxu0 %v842_v33  ;;  %v1083_v40 = vld [vmem:[#allocation5 + $0x180] sm:$0xff]   ;;  %v1090_v48 = vld [vmem:[#allocation5 + $0x158] sm:$0xff]  }
  0x43   :  { %941 = vmatprep.subr.bf16.mxu1 %v1059_v14  ;;  %v843_v37 = vcombine.low %v62_v36, %v62_v36  ;;  %v844_v38 = vcombine.high %v62_v36, %v62_v36  ;;  %v1084_v41 = vld [vmem:[#allocation5 + $0x148] sm:$0xff]   ;;  %v1087_v45 = vld [vmem:[#allocation5 + $0x150] sm:$0xff]   ;;  %v1091_v49 = vld [vmem:[#allocation5 + $0x118] sm:$0xff]  }
  0x44   :  { %920 = vmatpush3.bf16.msra.mxu0 %v1058_v13  ;;  %v1085_v43 = vld [vmem:[#allocation5 + $0x108] sm:$0xff]   ;;  %v1088_v46 = vld [vmem:[#allocation5 + $0x110] sm:$0xff]   ;;  %v1093_v50 = vld [vmem:[#allocation5 + $0x160] sm:$0xff]  }
  0x45   :  { %921 = vmatprep.subr.bf16.mxu0 %v1061_v16  ;;  %617 = vmatprep.mubr.bf16.mxu1 %v844_v38  ;;  %v1086_v44 = vld [vmem:[#allocation5 + $0x188] sm:$0xff]   ;;  %v1089_v47 = vld [vmem:[#allocation5 + $0x190] sm:$0xff]   ;;  %v1092_v51 = vld [vmem:[#allocation5 + $0x198] sm:$0xff]  }
  0x46   :  { %942 = vmatpush3.bf16.msra.mxu1 %v1060_v15  ;;  %v1094_v52 = vld [vmem:[#allocation5 + $0x120] sm:$0xff]   ;;  %v1096_v53 = vld [vmem:[#allocation5 + $0x168] sm:$0xff]   ;;  %v1099_v56 = vld [vmem:[#allocation5 + $0x170] sm:$0xff]  }
  0x47   :  { %943 = vmatprep.subr.bf16.mxu1 %v1063_v18  ;;  %v1095_v54 = vld [vmem:[#allocation5 + $0x1a0] sm:$0xff]   ;;  %v1097_v55 = vld [vmem:[#allocation5 + $0x128] sm:$0xff]   ;;  %v1100_v58 = vld [vmem:[#allocation5 + $0x130] sm:$0xff]  }
  0x48   :  { %922 = vmatpush3.bf16.msra.mxu0 %v1062_v17  ;;  %v1098_v57 = vld [vmem:[#allocation5 + $0x1a8] sm:$0xff]   ;;  %v63_v59 = vld [vmem:[#allocation2 + $0x10] sm:$0xff]  ;;  %v1107_v2 = vld [vmem:[#allocation2 + $0x18] ss:$0 sps:$4 sm:$0xff]  }
  0x49   :  { %923 = vmatprep.subr.bf16.mxu0 %v1065_v20  ;;  %v1101_v60 = vld [vmem:[#allocation5 + $0x1b0] sm:$0xff]   ;;  %v846_v61 = vcombine.high %v63_v59, %v63_v59  ;;  %v1102_v62 = vld [vmem:[#allocation5 + $0x178] sm:$0xff]   ;;  %v845_v1 = vcombine.low %v63_v59, %v63_v59  ;;  %v1108_v3 = vld [vmem:[#allocation7] sm:$0xff]  }
  0x4a   :  { %944 = vmatpush3.bf16.msra.mxu1 %v1064_v19  ;;  %v1103_v63 = vld [vmem:[#allocation5 + $0x138] sm:$0xff]   ;;  %v1109_v4 = vld [vmem:[#allocation7 + $0x8] sm:$0xff]   ;;  %v1110_v5 = vld [vmem:[#allocation7 + $0x10] sm:$0xff]  }
  0x4b   :  { %945 = vmatprep.subr.bf16.mxu1 %v1067_v22  ;;  %v1106_v0 = vld [vmem:[#allocation5 + $0x1b8] sm:$0xff]   ;;  %v1112_v7 = vld [vmem:[#allocation7 + $0x20] sm:$0xff]   ;;  %v1113_v8 = vld [vmem:[#allocation7 + $0x28] sm:$0xff]  }
  0x4c   :  { %924 = vmatpush3.bf16.msra.mxu0 %v1066_v21  ;;  %v1111_v6 = vld [vmem:[#allocation7 + $0x18] sm:$0xff]   ;;  %v1114_v9 = vld [vmem:[#allocation7 + $0x30] sm:$0xff]   ;;  %v840_v12 = vld [vmem:[%s1334_s2] ss:$0 sm:$0xff] }
  0x4d   :  { %925 = vmatprep.subr.bf16.mxu0 %v1069_v24  ;;  %v1115_v10 = vld [vmem:[#allocation7 + $0x38] sm:$0xff]  }
  0x4e   :  { %946 = vmatpush3.bf16.msra.mxu1 %v1068_v23 }
  0x4f   :  { %947 = vmatprep.subr.bf16.mxu1 %v1071_v26 }
  0x50   :  { %926 = vmatpush3.bf16.msra.mxu0 %v1070_v25 }
  0x51   :  { %927 = vmatprep.subr.bf16.mxu0 %v1073_v28 }
  0x52   :  { %948 = vmatpush3.bf16.msra.mxu1 %v1072_v27 }
  0x53   :  { %949 = vmatprep.subr.bf16.mxu1 %v1075_v30 }
  0x54   :  { %928 = vmatpush3.bf16.msra.mxu0 %v1074_v29 }
  0x55   :  { %957 = vmatprep.subr.bf16.mxu0 %v1079_v35 }
  0x56   :  { %950 = vmatpush3.bf16.msra.mxu1 %v1078_v34 }
  0x57   :  { %578 = vmatmul.mubr.bf16.vlgmr.msra.gmra.mrb[0].mxu0 %v841_v32  ;;  %997 = vmatprep.subr.bf16.mxu1 %v1219_v42 }
  0x58   :  { %958 = vmatpush3.bf16.msra.mxu0 %v1082_v39  ;;  %657 = vmatprep.mubr.bf16.mxu0 %v846_v61 }
  0x59   :  { %618 = vmatmul.mubr.bf16.vlgmr.msra.gmra.mrb[0].mxu1 %v843_v37  ;;  %959 = vmatprep.subr.bf16.mxu0 %v1084_v41  ;;  %v904_v37 = vld [vmem:[%s1336_s4] ss:$0 sm:$0xff] }
  0x5a   :  { %998 = vmatpush3.bf16.msra.mxu1 %v1083_v40  ;;  %1013 = vmatprep.mubr.msk.bf16.mxu1 %vm1220_vm0, %v1219_v42 }
  0x5b   :  { %999 = vmatprep.subr.bf16.mxu1 %v1219_v42 }
  0x5c   :  { %960 = vmatpush3.bf16.msra.mxu0 %v1085_v43 }
  0x5d   :  { %961 = vmatprep.subr.bf16.mxu0 %v1087_v45 }
  0x5e   :  { %1000 = vmatpush3.bf16.msra.mxu1 %v1086_v44 }
  0x5f   :  { %1001 = vmatprep.subr.bf16.mxu1 %v1219_v42 }
  0x60   :  { %962 = vmatpush3.bf16.msra.mxu0 %v1088_v46 }
  0x61   :  { %963 = vmatprep.subr.bf16.mxu0 %v1090_v48 }
  0x62   :  { %1002 = vmatpush3.bf16.msra.mxu1 %v1089_v47 }
  0x63   :  { %1003 = vmatprep.subr.bf16.mxu1 %v1219_v42 }
  0x64   :  { %964 = vmatpush3.bf16.msra.mxu0 %v1091_v49 }
  0x65   :  { %965 = vmatprep.subr.bf16.mxu0 %v1093_v50 }
  0x66   :  { %1004 = vmatpush3.bf16.msra.mxu1 %v1092_v51 }
  0x67   :  { %1005 = vmatprep.subr.bf16.mxu1 %v1219_v42 }
  0x68   :  { %966 = vmatpush3.bf16.msra.mxu0 %v1094_v52 }
  0x69   :  { %967 = vmatprep.subr.bf16.mxu0 %v1096_v53 }
  0x6a   :  { %1006 = vmatpush3.bf16.msra.mxu1 %v1095_v54 }
  0x6b   :  { %1007 = vmatprep.subr.bf16.mxu1 %v1219_v42 }
  0x6c   :  { %968 = vmatpush3.bf16.msra.mxu0 %v1097_v55 }
  0x6d   :  { %969 = vmatprep.subr.bf16.mxu0 %v1099_v56 }
  0x6e   :  { %1008 = vmatpush3.bf16.msra.mxu1 %v1098_v57 }
  0x6f   :  { %1009 = vmatprep.subr.bf16.mxu1 %v1219_v42 }
  0x70   :  { %970 = vmatpush3.bf16.msra.mxu0 %v1100_v58 }
  0x71   :  { %971 = vmatprep.subr.bf16.mxu0 %v1102_v62 }
  0x72   :  { %1010 = vmatpush3.bf16.msra.mxu1 %v1101_v60 }
  0x73   :  { %1011 = vmatprep.subr.bf16.mxu1 %v1219_v42 }
  0x74   :  { %972 = vmatpush3.bf16.msra.mxu0 %v1103_v63 }
  0x75   :  { %1017 = vmatprep.subr.bf16.mxu0 %v1219_v42 }
  0x76   :  { %1012 = vmatpush3.bf16.msra.mxu1 %v1106_v0 }
  0x77   :  { %658 = vmatmul.mubr.bf16.vlgmr.msra.gmra.mrb[4].mxu0 %v845_v1 }
  0x78   :  { %1033 = vmatprep.mubr.msk.bf16.mxu0 %vm1220_vm0, %v1219_v42  ;;  %1018 = vmatpush3.bf16.msra.mxu0 %v1108_v3 }
  0x79   :  { %1014 = vmatmul.mubr.bf16.vlgmr.msra.gmra.mrb[4].mxu1 %v1107_v2  ;;  %1019 = vmatprep.subr.bf16.mxu0 %v1219_v42 }
  0x7c   :  { %1020 = vmatpush3.bf16.msra.mxu0 %v1109_v4 }
  0x7d   :  { %1021 = vmatprep.subr.bf16.mxu0 %v1219_v42 }
  0x80   :  { %1022 = vmatpush3.bf16.msra.mxu0 %v1110_v5 }
  0x81   :  { %1023 = vmatprep.subr.bf16.mxu0 %v1219_v42 }
  0x84   :  { %1024 = vmatpush3.bf16.msra.mxu0 %v1111_v6 }
  0x85   :  { %1025 = vmatprep.subr.bf16.mxu0 %v1219_v42 }
  0x88   :  { %1026 = vmatpush3.bf16.msra.mxu0 %v1112_v7 }
  0x89   :  { %1027 = vmatprep.subr.bf16.mxu0 %v1219_v42 }
  0x8c   :  { %1028 = vmatpush3.bf16.msra.mxu0 %v1113_v8 }
  0x8d   :  { %1029 = vmatprep.subr.bf16.mxu0 %v1219_v42 }
  0x90   :  { %1030 = vmatpush3.bf16.msra.mxu0 %v1114_v9 }
  0x91   :  { %1031 = vmatprep.subr.bf16.mxu0 %v1219_v42 }
  0x94   :  { %1032 = vmatpush3.bf16.msra.mxu0 %v1115_v10 }
 0x12a   :  { %v929_v11 = vpop.f32.mrb[0].mxu0 }
 0x12b   :  { %v930_v13 = vpop.f32.mrb[1].mxu0 }
 0x12c   :  { %v931_v14 = vadd.f32 %v930_v13, %v929_v11  ;;  %v932_v15 = vpop.f32.mrb[2].mxu0  ;;  %v951_v16 = vpop.f32.mrb[0].mxu1 }
 0x12d   :  { %v933_v17 = vpop.f32.mrb[3].mxu0  ;;  %v952_v18 = vpop.f32.mrb[1].mxu1 }
 0x12e   :  { %v580_v19 = vadd.f32 %v931_v14, %v840_v12  ;;  %v953_v20 = vadd.f32 %v952_v18, %v951_v16  ;;  %v954_v21 = vpop.f32.mrb[2].mxu1 }
 0x12f   :  { %v955_v22 = vpop.f32.mrb[3].mxu1 }
 0x130   :  { %v620_v23 = vadd.f32 %v953_v20, %v580_v19 }
 0x14a   :  { %v973_v24 = vpop.f32.mrb[4].mxu0 }
 0x14b   :  { %v974_v25 = vpop.f32.mrb[5].mxu0 }
 0x14c   :  { %v975_v26 = vadd.f32 %v974_v25, %v973_v24  ;;  %v976_v27 = vpop.f32.mrb[6].mxu0  ;;  %v699_v28 = vpop.f32.mrb[4].mxu1 }
 0x14d   :  { %v977_v29 = vpop.f32.mrb[7].mxu0  ;;  %v1015_v30 = vpop.f32.mrb[5].mxu1 }
 0x14e   :  { %v660_v31 = vadd.f32 %v975_v26, %v620_v23  ;;  %v702_v32 = vpop.f32.mrb[6].mxu1 }
 0x14f   :  { %v1016_v33 = vpop.f32.mrb[7].mxu1 }
 0x150   :  { %v700_v34 = vadd.f32 %v699_v28, %v660_v31 }
 0x152   :  { %v705_v35 = vmax.f32 %v700_v34, 0.0 }
 0x154   :  { %v706_v36 = vpack.c.bf16 %v705_v35, %v705_v35 }
 0x156   :  { %1034 = vmatmul.mubr.bf16.vlgmr.msra.gmra.mrb[8].mxu0 %v706_v36 }
 0x229   :  { %v812_v38 = vpop.f32.mrb[8].mxu0 }
 0x22a   :  { %v813_v39 = vadd.f32 %v904_v37, %v812_v38  ;;  %v1035_v40 = vpop.f32.mrb[9].mxu0 }
 0x22b   :  { %v815_v41 = vpop.f32.mrb[10].mxu0 }
 0x22c   :  { %v818_v42 = vsub.f32 0.0, %v813_v39  ;;  %v1036_v43 = vpop.f32.mrb[11].mxu0 }
 0x22e   :  { %v819_v44 = vmul.f32 1.442695, %v818_v42 }
 0x230   :  { %1116 = vpow2.f32 %v819_v44 }
 0x23a   :  { %v1117_v45 = vpop.eup %1116 }
 0x23b   :  { %v821_v46 = vadd.f32 1.0, %v1117_v45 }
 0x23d   :  { %1118 = vrcp.f32 %v821_v46 }
 0x247   :  { %v1119_v47 = vpop.eup %1118 }
 0x248   :  { %823 = vst [vmem:[#allocation8] sm:$0xff] %v1119_v47 }
 0x249   :  { %1197 = shalt.err (!%p1194_p0)
}
 0x24a   :  { %s1198_s10 = scalar_lea.hbm %s1337_s5, 128 }
 0x24b   :  { %p1199_p1 = scmp.ne.s32.totalorder %s1337_s5, %s1198_s10  ;;  %p1202_p2 = scmp.lt.u32.totalorder %s1198_s10, %s1337_s5 }
 0x24d   :  { %p1204_p3 = pnand %p1202_p2, %p1199_p1 }
 0x24f   :  { %1207 = shalt.err (!%p1204_p3)
}
 0x250   :  { %833 = dma.vmem_to_hbm [thread:$0]  %s831_s7, 128, %s1337_s5, [#allocation4]  }
 0x251   :  { %1212 = dma.done.wait [#allocation4], 128  }
 0x252   :  { %1213 = vsyncadd [#allocation4], 4294967168 }
 0x253   :  { %837 = vsyncpa [#allocation3], 1 }
 0x254   :  { %838 = vsyncpa [#allocation6], 1 }
 0x255   :  { %839 = vsyncpa [#allocation4], 1 }

</bundles_post_ra>
